<compile_context>
chip_gen: v6e
topology: v6e:2x2x1
jax: 0.10.0
libtpu: 0.0.40
codegen_flags: <defaults>
</compile_context>

<pallas_src>
import functools
import math

import jax
import jax.numpy as jnp
from jax.experimental import pallas as pl
from jax.experimental.pallas import tpu as pltpu

VMEM_LIMIT = 32 * 1024 * 1024  # explicit scoped-VMEM budget (safe on v5e/v6e/v7x)

# bf16 MXU inputs only when actually running on TPU hardware; f32 otherwise so
# the same kernel also executes cleanly under interpret / CPU dot thunks.
_ON_TPU = jax.default_backend() == "tpu"
_MM_DTYPE = jnp.bfloat16 if _ON_TPU else jnp.float32


# ----------------------------------------------------------------------------
# Pallas kernels
# ----------------------------------------------------------------------------
def _mm_kernel(w_ref, a_ref, b_ref, o_ref, *, act):
    # w: (O, K), a: (K, TM), b: (O, 1) f32  ->  o: (O, TM) f32.
    # Lane dim of the output is TM (multiple of 128) -> unmasked stores.
    acc = jnp.dot(w_ref[...], a_ref[...], preferred_element_type=jnp.float32)
    acc = acc + b_ref[...]
    if act == "lrelu":
        acc = jnp.where(acc >= 0, acc, 0.1 * acc)
    elif act == "relu":
        acc = jnp.maximum(acc, 0.0)
    o_ref[...] = acc


def matmul_bias_act(w, a, b, act="none"):
    """act(w @ a + b).  w: (O, K), a: (K, M), b: (O,) f32 -> (O, M) f32."""
    O, K = w.shape
    M = a.shape[1]
    m128 = ((M + 127) // 128) * 128
    TM = min(512, m128)                       # large lane-dense M tiles
    Mp = ((M + TM - 1) // TM) * TM
    if Mp != M:
        a = jnp.pad(a, ((0, 0), (0, Mp - M)))
    out = pl.pallas_call(
        functools.partial(_mm_kernel, act=act),
        out_shape=jax.ShapeDtypeStruct((O, Mp), jnp.float32),
        grid_spec=pltpu.PrefetchScalarGridSpec(
            num_scalar_prefetch=0,
            grid=(Mp // TM,),
            in_specs=[
                pl.BlockSpec((O, K), lambda i: (0, 0)),
                pl.BlockSpec((K, TM), lambda i: (0, i)),
                pl.BlockSpec((O, 1), lambda i: (0, 0)),
            ],
            out_specs=pl.BlockSpec((O, TM), lambda i: (0, i)),
        ),
        compiler_params=pltpu.CompilerParams(
            dimension_semantics=("parallel",),
            vmem_limit_bytes=VMEM_LIMIT,
        ),
    )(w, a, b.reshape(O, 1))
    return out[:, :M] if Mp != M else out


def _attn_kernel(q_ref, k_ref, v_ref, o_ref, *, scale, T, hd):
    # q/k/v/o: (heads, T, hd, TP) f32, pixel batch on the lane dim.  T and hd
    # are tiny (e.g. 5 / 4): scores and P@V are VPU broadcast-multiply-reduce,
    # softmax reduces over a sublane axis -- no MXU padding waste.
    q = q_ref[...]
    k = k_ref[...]
    v = v_ref[...]
    s = q[:, :, None, 0, :] * k[:, None, :, 0, :]
    for d in range(1, hd):
        s = s + q[:, :, None, d, :] * k[:, None, :, d, :]
    s = s * scale                                            # (heads, T, T, TP)
    s = s - jnp.max(s, axis=2, keepdims=True)
    e = jnp.exp(s)
    p = e / jnp.sum(e, axis=2, keepdims=True)
    o = p[:, :, 0, None, :] * v[:, None, 0, :, :]
    for j in range(1, T):
        o = o + p[:, :, j, None, :] * v[:, None, j, :, :]
    o_ref[...] = o                                           # (heads, T, hd, TP)


@functools.partial(jax.jit, static_argnames=("scale",))
def attn_core(q, k, v, scale):
    # q, k, v: (heads, T, hd, P) f32; P = pixel batch, gridded + double-buffered.
    heads, T, hd, P = q.shape
    p128 = ((P + 127) // 128) * 128
    TP = min(512, p128)
    Pp = ((P + TP - 1) // TP) * TP
    if Pp != P:
        pad = ((0, 0), (0, 0), (0, 0), (0, Pp - P))
        q, k, v = jnp.pad(q, pad), jnp.pad(k, pad), jnp.pad(v, pad)
    spec = pl.BlockSpec((heads, T, hd, TP), lambda i: (0, 0, 0, i))
    out = pl.pallas_call(
        functools.partial(_attn_kernel, scale=scale, T=T, hd=hd),
        out_shape=jax.ShapeDtypeStruct((heads, T, hd, Pp), jnp.float32),
        grid_spec=pltpu.PrefetchScalarGridSpec(
            num_scalar_prefetch=0,
            grid=(Pp // TP,),
            in_specs=[spec, spec, spec],
            out_specs=spec,
        ),
        compiler_params=pltpu.CompilerParams(
            dimension_semantics=("parallel",),
            vmem_limit_bytes=VMEM_LIMIT,
        ),
    )(q, k, v)
    return out[..., :P] if Pp != P else out


# ----------------------------------------------------------------------------
# Conv via im2col (K, M) + lane-dense Pallas matmul
# ----------------------------------------------------------------------------
def _im2col_kT(xp, k, stride, Ho, Wo):
    # xp: (N, C, Hpad, Wpad) -> (C*k*k, N*Ho*Wo); K ordered (c, tap) to match
    # the (O, C, kh, kw) weight reshape, M ordered (n, ho, wo).
    N, C = xp.shape[0], xp.shape[1]
    taps = []
    for i in range(k):
        for j in range(k):
            taps.append(xp[:, :, i:i + (Ho - 1) * stride + 1:stride,
                           j:j + (Wo - 1) * stride + 1:stride])
    A = jnp.stack(taps, axis=2)              # (N, C, k*k, Ho, Wo)
    A = A.transpose(1, 2, 0, 3, 4)           # (C, k*k, N, Ho, Wo)
    return A.reshape(C * k * k, N * Ho * Wo)


@functools.partial(jax.jit, static_argnames=("stride", "act"))
def _conv_impl(w, b, x, stride, act):
    O, C, kh, kw = w.shape
    N, _, H, W = x.shape
    pad = kh // 2
    Ho = (H + 2 * pad - kh) // stride + 1
    Wo = (W + 2 * pad - kw) // stride + 1
    xb = x.astype(_MM_DTYPE)
    wb = w.reshape(O, C * kh * kw).astype(_MM_DTYPE)
    if kh == 1 and stride == 1:
        A = xb.transpose(1, 0, 2, 3).reshape(C, N * H * W)
    else:
        xp = jnp.pad(xb, ((0, 0), (0, 0), (pad, pad), (pad, pad)))
        A = _im2col_kT(xp, kh, stride, Ho, Wo)
    out = matmul_bias_act(wb, A, b, act)     # (O, N*Ho*Wo)
    return out.reshape(O, N, Ho, Wo).transpose(1, 0, 2, 3)


def conv2d(p, x, stride=1, act="none"):
    return _conv_impl(p["w"], p["b"], x, stride=stride, act=act)


@functools.partial(jax.jit, static_argnames=("dg", "act"))
def _dcn_conv_impl(w, b, x, mask, dg, act):
    # Zero-offset modulated 3x3 conv: regular taps scaled by the per-group,
    # per-tap modulation mask, folded into the im2col matrix.
    O, C, kh, kw = w.shape
    N, _, H, W = x.shape
    pad = kh // 2
    xp = jnp.pad(x, ((0, 0), (0, 0), (pad, pad), (pad, pad)))
    taps = [xp[:, :, i:i + H, j:j + W] for i in range(kh) for j in range(kw)]
    patches = jnp.stack(taps, axis=2)                        # (N, C, k*k, H, W)
    mm = mask.reshape(N, dg, kh * kw, H, W)
    patches = patches.reshape(N, dg, C // dg, kh * kw, H, W) * mm[:, :, None]
    A = patches.reshape(N, C, kh * kw, H, W).astype(_MM_DTYPE)
    A = A.transpose(1, 2, 0, 3, 4).reshape(C * kh * kw, N * H * W)
    wb = w.reshape(O, C * kh * kw).astype(_MM_DTYPE)
    out = matmul_bias_act(wb, A, b, act)
    return out.reshape(O, N, H, W).transpose(1, 0, 2, 3)


# ----------------------------------------------------------------------------
# Interpolation / pixel shuffle (glue)
# ----------------------------------------------------------------------------
def _interp_axis(x, axis, out_size):
    in_size = x.shape[axis]
    if in_size == out_size:
        return x
    scale = in_size / out_size
    o = jnp.arange(out_size, dtype=jnp.float32)
    src = jnp.clip((o + 0.5) * scale - 0.5, 0.0, in_size - 1)
    i0 = jnp.floor(src).astype(jnp.int32)
    i1 = jnp.minimum(i0 + 1, in_size - 1)
    w1 = src - i0.astype(jnp.float32)
    w0 = 1.0 - w1
    x0 = jnp.take(x, i0, axis=axis)
    x1 = jnp.take(x, i1, axis=axis)
    shp = [1] * x.ndim
    shp[axis] = out_size
    return x0 * w0.reshape(shp) + x1 * w1.reshape(shp)


def bilinear_x2(x):  # (N, C, H, W) -> (N, C, 2H, 2W), align_corners=False
    x = _interp_axis(x, 2, 2 * x.shape[2])
    return _interp_axis(x, 3, 2 * x.shape[3])


def trilinear_resize(x, sizes):  # x: (B, C, D, H, W), sizes: (D', H', W')
    x = _interp_axis(x, 2, sizes[0])
    x = _interp_axis(x, 3, sizes[1])
    return _interp_axis(x, 4, sizes[2])


def pixel_shuffle(x, r):
    N, C, H, W = x.shape
    Co = C // (r * r)
    x = x.reshape(N, Co, r, r, H, W).transpose(0, 1, 4, 2, 5, 3)
    return x.reshape(N, Co, H * r, W * r)


# ----------------------------------------------------------------------------
# Modules (functional forwards)
# ----------------------------------------------------------------------------
def dcn_sep_fwd(p, x, feat, dg, act="none"):
    off = conv2d(p["off"], feat)  # conv_offset is zero-initialized -> all zeros
    o1, o2, m = jnp.split(off, 3, axis=1)
    _offset = 10.0 * jnp.tanh(jnp.concatenate([o1, o2], axis=1))  # identically 0
    mask = jax.nn.sigmoid(m)  # identically 0.5
    # TODO(synk): general bilinear sampling of torchvision deform_conv2d for
    # nonzero offsets is not implemented; conv_offset is zero-init so sampling
    # locations are exactly the regular conv taps (zero-offset modulated conv).
    return _dcn_conv_impl(p["w"], p["b"], x, mask, dg=dg, act=act)


def pcd_align_fwd(p, fea1, fea2, dg):
    L3_off = jnp.concatenate([fea1[2], fea2[2]], axis=1)
    L3_off = conv2d(p["L3_oc1"], L3_off, act="lrelu")
    L3_off = conv2d(p["L3_oc2"], L3_off, act="lrelu")
    x = (fea1[2] + fea1[2]) / 2
    L3_fea = dcn_sep_fwd(p["L3_dcn"], x, L3_off, dg, act="lrelu")

    L2_off = jnp.concatenate([fea1[1], fea2[1]], axis=1)
    L2_off = conv2d(p["L2_oc1"], L2_off, act="lrelu")
    L3_off_up = bilinear_x2(L3_off)
    L2_off = conv2d(p["L2_oc2"], jnp.concatenate([L2_off, L3_off_up * 2], axis=1),
                    act="lrelu")
    L2_off = conv2d(p["L2_oc3"], L2_off, act="lrelu")
    x = (fea1[1] + fea1[1]) / 2
    L2_fea = dcn_sep_fwd(p["L2_dcn"], x, L2_off, dg, act="none")
    L3_fea_up = bilinear_x2(L3_fea)
    L2_fea = conv2d(p["L2_fc"], jnp.concatenate([L2_fea, L3_fea_up], axis=1),
                    act="lrelu")

    L1_off = jnp.concatenate([fea1[0], fea2[0]], axis=1)
    L1_off = conv2d(p["L1_oc1"], L1_off, act="lrelu")
    L2_off_up = bilinear_x2(L2_off)
    L1_off = conv2d(p["L1_oc2"], jnp.concatenate([L1_off, L2_off_up * 2], axis=1),
                    act="lrelu")
    L1_off = conv2d(p["L1_oc3"], L1_off, act="lrelu")
    x = (fea1[0] + fea1[0]) / 2
    L1_fea = dcn_sep_fwd(p["L1_dcn"], x, L1_off, dg, act="none")
    L2_fea_up = bilinear_x2(L2_fea)
    L1_fea = conv2d(p["L1_fc"], jnp.concatenate([L1_fea, L2_fea_up], axis=1),
                    act="none")
    return L1_fea


def easy_pcd_fwd(p, f1, f2, dg):
    B, C, H, W = f1.shape
    L1 = jnp.stack([f1, f2], axis=1).reshape(B * 2, C, H, W)
    L2 = conv2d(p["L2c1"], L1, stride=2, act="lrelu")
    L2 = conv2d(p["L2c2"], L2, act="lrelu")
    L3 = conv2d(p["L3c1"], L2, stride=2, act="lrelu")
    L3 = conv2d(p["L3c2"], L3, act="lrelu")
    L1 = L1.reshape(B, 2, C, H, W)
    L2 = L2.reshape(B, 2, C, H // 2, W // 2)
    L3 = L3.reshape(B, 2, C, H // 4, W // 4)
    fea1 = [L1[:, 0], L2[:, 0], L3[:, 0]]
    fea2 = [L1[:, 1], L2[:, 1], L3[:, 1]]
    aligned = pcd_align_fwd(p["pcd"], fea1, fea2, dg)
    return conv2d(p["fusion"], aligned)


def convlstm_cell_fwd(p, x, h, c):
    # TODO(synk): ConvLSTM / ConvLSTMCell base classes are not in the provided
    # source; the standard ConvLSTM cell (i,f,o,g gate order) is reconstructed.
    comb = jnp.concatenate([x, h], axis=1)
    cc = conv2d(p, comb)  # 4*hidden channels
    ci, cf, co, cg = jnp.split(cc, 4, axis=1)
    i = jax.nn.sigmoid(ci)
    f = jax.nn.sigmoid(cf)
    o = jax.nn.sigmoid(co)
    g = jnp.tanh(cg)
    c_next = f * c + i * g
    h_next = o * jnp.tanh(c_next)
    return h_next, c_next


def dclstm_fwd(p, x, dg):
    B, T, C, H, W = x.shape
    h = jnp.zeros((B, C, H, W), jnp.float32)
    c = jnp.zeros((B, C, H, W), jnp.float32)
    outs = []
    for t in range(T):
        xt = x[:, t]
        h_tmp = easy_pcd_fwd(p["pcd_h"], xt, h, dg)
        c_tmp = easy_pcd_fwd(p["pcd_c"], xt, c, dg)
        h, c = convlstm_cell_fwd(p["cell"], xt, h_tmp, c_tmp)
        outs.append(h)
    return jnp.stack(outs, axis=1)


def bidclstm_fwd(p, x, dg):
    x_rev = x[:, ::-1]
    out_fwd = dclstm_fwd(p["fwd"], x, dg)
    out_rev = dclstm_fwd(p["fwd"], x_rev, dg)  # shared weights
    rev_rev = out_rev[:, ::-1]
    B, T, C, H, W = out_fwd.shape
    result = jnp.concatenate([out_fwd, rev_rev], axis=2).reshape(B * T, 2 * C, H, W)
    result = conv2d(p["conv1x1"], result)
    return result.reshape(B, T, C, H, W)


@functools.partial(jax.jit, static_argnames=("num_heads",))
def temporal_attention_fwd(p, x, num_heads):
    # x: (P, T, C) with P = B*H*W pixels; lane-dense over M = P*T / over P.
    P_, T, C = x.shape
    hd = C // num_heads
    scale = hd ** (-0.5)
    a = x.reshape(P_ * T, C).T.astype(_MM_DTYPE)                  # (C, P*T)
    wqkv = p["qkv_w"].T.astype(_MM_DTYPE)                         # (3C, C)
    qkv = matmul_bias_act(wqkv, a, p["qkv_b"], "none")            # (3C, P*T)
    qkv = qkv.reshape(3, num_heads, hd, P_, T).transpose(0, 1, 4, 2, 3)
    o = attn_core(qkv[0], qkv[1], qkv[2], scale=scale)            # (H, T, hd, P)
    a2 = o.transpose(0, 2, 3, 1).reshape(C, P_ * T).astype(_MM_DTYPE)
    wproj = p["proj_w"].T.astype(_MM_DTYPE)
    y = matmul_bias_act(wproj, a2, p["proj_b"], "none")           # (C, P*T)
    return y.reshape(C, P_, T).transpose(1, 2, 0)                 # (P, T, C)


def net_fwd(p, x, nf, heads, dg):
    B, N, C, H, W = x.shape
    hh, ww = H, W
    x_t = x.transpose(0, 2, 1, 3, 4)                      # (B, C, N, H, W)
    upsample_x = trilinear_resize(x_t, (2 * N - 1, H * 4, W * 4))

    L1 = conv2d(p["conv_first"], x.reshape(B * N, C, H, W), act="lrelu")
    Hp = -(-H // 8) * 8
    Wp = -(-W // 8) * 8
    L1 = jnp.pad(L1, ((0, 0), (0, 0), (0, Hp - H), (0, Wp - W)))
    H2, W2 = Hp, Wp
    for rb in p["res_blocks"]:
        out = conv2d(rb["c1"], L1, act="relu")
        out = conv2d(rb["c2"], out)
        L1 = L1 + out
    L2 = conv2d(p["feaL2c1"], L1, stride=2, act="lrelu")
    L2 = conv2d(p["feaL2c2"], L2, act="lrelu")
    L3 = conv2d(p["feaL3c1"], L2, stride=2, act="lrelu")
    L3 = conv2d(p["feaL3c2"], L3, act="lrelu")
    L1 = L1.reshape(B, N, nf, H2, W2)
    L2 = L2.reshape(B, N, nf, H2 // 2, W2 // 2)
    L3 = L3.reshape(B, N, nf, H2 // 4, W2 // 4)

    to_lstm = []
    for idx in range(N - 1):
        fea1 = [L1[:, idx], L2[:, idx], L3[:, idx]]
        fea2 = [L1[:, idx + 1], L2[:, idx + 1], L3[:, idx + 1]]
        aligned = pcd_align_fwd(p["pcd_align"], fea1, fea2, dg)
        fusion = conv2d(p["fusion"], aligned)
        if idx == 0:
            to_lstm.append(fea1[0])
        to_lstm.append(fusion)
        to_lstm.append(fea2[0])
    lstm_feats = jnp.stack(to_lstm, axis=1)               # (B, 2N-1, nf, H2, W2)

    feats = bidclstm_fwd(p["blstm"], lstm_feats, dg)
    Bf, T, Cf, Hf, Wf = feats.shape
    arr = feats.transpose(0, 3, 4, 1, 2).reshape(Bf * Hf * Wf, T, Cf)
    arr = temporal_attention_fwd(p["attn"], arr, num_heads=heads)
    arr = arr.reshape(Bf, Hf, Wf, T, Cf).transpose(0, 3, 4, 1, 2)
    feats = feats + arr
    feats = feats.reshape(Bf * T, Cf, Hf, Wf)

    # TODO(synk): recon_trunk is Swin2SR (external dependency, not defined in the
    # provided source); replaced by identity on the nf-channel feature map.
    out = feats
    out = out[:, :, :hh, :ww]
    # LeakyReLU commutes with PixelShuffle (pure permutation), so it is fused
    # into the conv's Pallas kernel and the shuffle is applied afterwards.
    out = pixel_shuffle(conv2d(p["upconv1"], out, act="lrelu"), 2)
    out = pixel_shuffle(conv2d(p["upconv2"], out, act="lrelu"), 2)
    out = conv2d(p["HRconv"], out, act="lrelu")
    out = conv2d(p["conv_last"], out)
    K_, G_ = out.shape[-2], out.shape[-1]
    outs = out.reshape(Bf, T, -1, K_, G_)
    outs = outs + upsample_x.transpose(0, 2, 1, 3, 4)
    return outs


# ----------------------------------------------------------------------------
# Deterministic parameter construction
# ----------------------------------------------------------------------------
class KeyGen:
    def __init__(self, seed):
        self._key = jax.random.PRNGKey(seed)
        self._i = 0

    def __call__(self):
        self._i += 1
        return jax.random.fold_in(self._key, self._i)


def conv_p(kg, out_c, in_c, k, zero=False):
    if zero:
        w = jnp.zeros((out_c, in_c, k, k), jnp.float32)
    else:
        std = 0.5 / math.sqrt(in_c * k * k)
        w = std * jax.random.normal(kg(), (out_c, in_c, k, k), jnp.float32)
    return {"w": w, "b": jnp.zeros((out_c,), jnp.float32)}


def linear_p(kg, in_f, out_f):
    std = 0.5 / math.sqrt(in_f)
    return (std * jax.random.normal(kg(), (in_f, out_f), jnp.float32),
            jnp.zeros((out_f,), jnp.float32))


def dcn_p(kg, nf, dg):
    base = conv_p(kg, nf, nf, 3)
    return {"w": base["w"], "b": base["b"],
            "off": conv_p(kg, dg * 3 * 9, nf, 3, zero=True)}  # zero-init conv_offset


def pcd_p(kg, nf, dg):
    return {
        "L3_oc1": conv_p(kg, nf, 2 * nf, 3), "L3_oc2": conv_p(kg, nf, nf, 3),
        "L3_dcn": dcn_p(kg, nf, dg),
        "L2_oc1": conv_p(kg, nf, 2 * nf, 3), "L2_oc2": conv_p(kg, nf, 2 * nf, 3),
        "L2_oc3": conv_p(kg, nf, nf, 3), "L2_dcn": dcn_p(kg, nf, dg),
        "L2_fc": conv_p(kg, nf, 2 * nf, 3),
        "L1_oc1": conv_p(kg, nf, 2 * nf, 3), "L1_oc2": conv_p(kg, nf, 2 * nf, 3),
        "L1_oc3": conv_p(kg, nf, nf, 3), "L1_dcn": dcn_p(kg, nf, dg),
        "L1_fc": conv_p(kg, nf, 2 * nf, 3),
    }


def easy_pcd_p(kg, nf, dg):
    return {
        "L2c1": conv_p(kg, nf, nf, 3), "L2c2": conv_p(kg, nf, nf, 3),
        "L3c1": conv_p(kg, nf, nf, 3), "L3c2": conv_p(kg, nf, nf, 3),
        "pcd": pcd_p(kg, nf, dg), "fusion": conv_p(kg, nf, nf, 1),
    }


def net_params(kg, nf, front_RBs, dg):
    qkv_w, qkv_b = linear_p(kg, nf, 3 * nf)
    proj_w, proj_b = linear_p(kg, nf, nf)
    return {
        "conv_first": conv_p(kg, nf, 3, 3),
        "res_blocks": [{"c1": conv_p(kg, nf, nf, 3), "c2": conv_p(kg, nf, nf, 3)}
                       for _ in range(front_RBs)],
        "feaL2c1": conv_p(kg, nf, nf, 3), "feaL2c2": conv_p(kg, nf, nf, 3),
        "feaL3c1": conv_p(kg, nf, nf, 3), "feaL3c2": conv_p(kg, nf, nf, 3),
        "pcd_align": pcd_p(kg, nf, dg),
        "fusion": conv_p(kg, nf, nf, 1),
        "blstm": {
            "fwd": {"pcd_h": easy_pcd_p(kg, nf, dg),
                    "pcd_c": easy_pcd_p(kg, nf, dg),
                    "cell": conv_p(kg, 4 * nf, 2 * nf, 3)},
            "conv1x1": conv_p(kg, nf, 2 * nf, 1),
        },
        "attn": {"qkv_w": qkv_w, "qkv_b": qkv_b, "proj_w": proj_w, "proj_b": proj_b},
        "upconv1": conv_p(kg, nf * 4, nf, 3),
        "upconv2": conv_p(kg, 64 * 4, nf, 3),
        "HRconv": conv_p(kg, 64, 64, 3),
        "conv_last": conv_p(kg, 3, 64, 3),
    }


# ----------------------------------------------------------------------------
if __name__ == "__main__":
    nf, heads, dg, front_RBs = 32, 8, 4, 2
    B, N, C, H, W = 1, 3, 3, 8, 8

    kg = KeyGen(0)
    params = net_params(kg, nf, front_RBs, dg)

    x = jax.random.normal(jax.random.PRNGKey(0), (B, N, C, H, W), jnp.float32)

    out = net_fwd(params, x, nf, heads, dg)
    out = jax.block_until_ready(out)

    assert out.shape == (B, 2 * N - 1, 3, 4 * H, 4 * W), out.shape
    assert bool(jnp.all(jnp.isfinite(out)))
    print("KERNEL_OK")
</pallas_src>

<mosaic_0001>
module attributes {stable_mosaic.version = 11 : i64} {
  func.func @_mm_kernel(%arg0: i32, %arg1: memref<32x27xf32, #tpu.memory_space<vmem>>, %arg2: memref<27x256xf32, #tpu.memory_space<vmem>>, %arg3: memref<32x1xf32, #tpu.memory_space<vmem>>, %arg4: memref<32x256xf32, #tpu.memory_space<vmem>>) attributes {dimension_semantics = [#tpu.dimension_semantics<parallel>], iteration_bounds = array<i64: 1>, scalar_prefetch = 0 : i64, scratch_operands = 0 : i64, tpu.core_type = #tpu.core_type<tc>, window_params = [{pipeline_mode = #tpu.pipeline_mode<synchronous>, transform_indices = @transform_0, window_bounds = array<i64: 32, 27>}, {transform_indices = @transform_1, window_bounds = array<i64: 27, 256>}, {pipeline_mode = #tpu.pipeline_mode<synchronous>, transform_indices = @transform_2, window_bounds = array<i64: 32, 1>}, {transform_indices = @transform_3, window_bounds = array<i64: 32, 256>}]} {
    %c0 = arith.constant 0 : index
    %c0_0 = arith.constant 0 : index
    %0 = vector.load %arg1[%c0, %c0_0] : memref<32x27xf32, #tpu.memory_space<vmem>>, vector<32x27xf32>
    %c0_1 = arith.constant 0 : index
    %c0_2 = arith.constant 0 : index
    %1 = vector.load %arg2[%c0_1, %c0_2] : memref<27x256xf32, #tpu.memory_space<vmem>>, vector<27x256xf32>
    %cst = arith.constant dense<0.000000e+00> : vector<32x256xf32>
    %2 = tpu.matmul %0, %1, %cst {dimension_numbers = #tpu.dot_dimension_numbers<[1], [0], [0], [1], [0, 0, 1, 1], [], []>} : vector<32x27xf32>, vector<27x256xf32>, vector<32x256xf32> -> vector<32x256xf32>
    %c0_3 = arith.constant 0 : index
    %c0_4 = arith.constant 0 : index
    %3 = vector.load %arg3[%c0_3, %c0_4] : memref<32x1xf32, #tpu.memory_space<vmem>>, vector<32x1xf32>
    %4 = vector.broadcast %3 : vector<32x1xf32> to vector<32x256xf32>
    %5 = arith.addf %2, %4 : vector<32x256xf32>
    %cst_5 = arith.constant 0.000000e+00 : f32
    %6 = vector.broadcast %cst_5 : f32 to vector<32x256xf32>
    %7 = arith.cmpf oge, %5, %6 : vector<32x256xf32>
    %cst_6 = arith.constant 1.000000e-01 : f32
    %8 = vector.broadcast %cst_6 : f32 to vector<32x256xf32>
    %9 = arith.mulf %8, %5 : vector<32x256xf32>
    %10 = arith.select %7, %5, %9 : vector<32x256xi1>, vector<32x256xf32>
    %c0_7 = arith.constant 0 : index
    %c0_8 = arith.constant 0 : index
    %11 = vector.load %arg4[%c0_7, %c0_8] : memref<32x256xf32, #tpu.memory_space<vmem>>, vector<32x256xf32>
    tpu.vector_store %arg4[%c0_7, %c0_8], %10 {strides = array<i32>} : memref<32x256xf32, #tpu.memory_space<vmem>>, vector<32x256xf32>,
    return
  }
  func.func @transform_0(%arg0: i32) -> (i32, i32) {
    %c0_i32 = arith.constant 0 : i32
    %c0_i32_0 = arith.constant 0 : i32
    %c0_i32_1 = arith.constant 0 : i32
    return %c0_i32, %c0_i32_0 : i32, i32
  }
  func.func @transform_1(%arg0: i32) -> (i32, i32) {
    %c0_i32 = arith.constant 0 : i32
    %c0_i32_0 = arith.constant 0 : i32
    return %c0_i32, %arg0 : i32, i32
  }
  func.func @transform_2(%arg0: i32) -> (i32, i32) {
    %c0_i32 = arith.constant 0 : i32
    %c0_i32_0 = arith.constant 0 : i32
    %c0_i32_1 = arith.constant 0 : i32
    return %c0_i32, %c0_i32_0 : i32, i32
  }
  func.func @transform_3(%arg0: i32) -> (i32, i32) {
    %c0_i32 = arith.constant 0 : i32
    %c0_i32_0 = arith.constant 0 : i32
    return %c0_i32, %arg0 : i32, i32
  }
}

</mosaic_0001>

<bundles_post_ra>
// kernel: _conv_impl.1
= control target key start
LH: loop header
LB: loop body
LE: loop exit
PB: predicated region body
PF: predicated region fallthrough
CT: control target
= control target key end

     0   :  { %vm63_vm0 = vcmask 1042432   ;;  %v213_v3 = vmov 0.0   ;;  %vm50_vm1 = vcmask 220160   ;;  %v214_v15 = vmov 0   ;;  %s311_s1 = inlined_call_operand.vmem [shape: f32[27,256], index: 1, kind: input, shape index: {}]   ;;  %s312_s0 = inlined_call_operand.vmem [shape: f32[32,27], index: 0, kind: input, shape index: {}]   ;;  %s313_s2 = inlined_call_operand.vmem [shape: f32[32,1], index: 2, kind: input, shape index: {}]   ;;  %s314_s3 = inlined_call_operand.vmem [shape: f32[32,256], index: 3, kind: output, shape index: {}]  }
   0x1   :  { %v25_v0 = vld [vmem:[%s311_s1 + $0x38] sm:$0x7]  ;;  %v24_v1 = vld [vmem:[%s311_s1 + $0x30] sm:$0x7]  ;;  %v23_v2 = vld [vmem:[%s311_s1 + $0x28] sm:$0xff]  ;;  %134 = vmatprep.mubr.f32.mxu0 %v213_v3  ;;  %146 = vmatprep.mubr.f32.mxu1 %v213_v3 }
   0x2   :  { %195 = vmatprep.subr.msk.mxu0 %vm63_vm0, %v25_v0  ;;  %201 = vmatprep.subr.msk.mxu1 %vm63_vm0, %v25_v0  ;;  %v22_v4 = vld [vmem:[%s311_s1 + $0x20] sm:$0xff]  ;;  %v21_v5 = vld [vmem:[%s311_s1 + $0x18] sm:$0xff]  ;;  %v20_v6 = vld [vmem:[%s311_s1 + $0x10] sm:$0xff] }
   0x3   :  { %196 = vmatpush1.msk.msra.mxu0 %vm63_vm0, %v24_v1  ;;  %205 = vmatpush1.msk.msra.mxu1 %vm63_vm0, %v24_v1  ;;  %v19_v7 = vld [vmem:[%s311_s1 + $0x8] sm:$0xff]  ;;  %v18_v8 = vld [vmem:[%s311_s1] sm:$0xff]  ;;  %v16_v10 = vld [vmem:[%s312_s0 + $0x10] sm:$0xff] }
   0x4   :  { %96 = vmatprep.subr.mxu0 %v23_v2  ;;  %202 = vmatprep.subr.mxu1 %v23_v2  ;;  %v14_v9 = vld [vmem:[%s312_s0] sm:$0xff]  ;;  %v28_v11 = vld [vmem:[%s313_s2 + $0x10] sm:$0xff]  ;;  %v15_v13 = vld [vmem:[%s312_s0 + $0x8] sm:$0xff] }
   0x5   :  { %97 = vmatpush1.msra.mxu0 %v22_v4  ;;  %206 = vmatpush1.msra.mxu1 %v22_v4  ;;  %v26_v12 = vld [vmem:[%s313_s2] sm:$0xff]  ;;  %v17_v14 = vld [vmem:[%s312_s0 + $0x18] sm:$0xff]  ;;  %v27_v17 = vld [vmem:[%s313_s2 + $0x8] sm:$0xff] }
   0x6   :  { %98 = vmatprep.subr.mxu0 %v21_v5  ;;  %203 = vmatprep.subr.mxu1 %v21_v5  ;;  %v29_v16 = vld [vmem:[%s313_s2 + $0x18] sm:$0xff] }
   0x7   :  { %99 = vmatpush1.msra.mxu0 %v20_v6  ;;  %207 = vmatpush1.msra.mxu1 %v20_v6 }
   0x8   :  { %100 = vmatprep.subr.mxu0 %v19_v7  ;;  %204 = vmatprep.subr.mxu1 %v19_v7 }
   0x9   :  { %101 = vmatpush1.msra.mxu0 %v18_v8  ;;  %208 = vmatpush1.msra.mxu1 %v18_v8 }
   0xa   :  { %197 = vmatmul.mubr.msk.f32.vlgmr.msra.gmra.mxu0 %vm50_vm1, %v14_v9  ;;  %199 = vmatmul.mubr.msk.f32.vlgmr.msra.gmra.mxu1 %vm50_vm1, %v16_v10 }
   0xb   :  { %140 = vmatprep.mubr.f32.mxu0 %v213_v3  ;;  %152 = vmatprep.mubr.f32.mxu1 %v213_v3 }
   0xc   :  { %212 = vset.pattern.permute.xlu1 %v214_v15  ;;  %211 = vset.pattern.permute.xlu0 %v214_v15 }
   0xd   :  { %42 = vperm.xlu1 %212, %v28_v11   ;;  %32 = vperm.xlu0 %211, %v26_v12  }
   0xe   :  { %198 = vmatmul.mubr.msk.f32.gmra.mxu0 %vm50_vm1, %v15_v13  ;;  %200 = vmatmul.mubr.msk.f32.gmra.mxu1 %vm50_vm1, %v17_v14 }
  0x11   :  { %47 = vperm.xlu1 %212, %v29_v16   ;;  %37 = vperm.xlu0 %211, %v27_v17  }
  0x88   :  { %v43_v18 = vpop.permute.xlu1 %42  ;;  %v33_v19 = vpop.permute.xlu0 %32 }
  0x8c   :  { %v48_v28 = vpop.permute.xlu1 %47  ;;  %v38_v29 = vpop.permute.xlu0 %37 }
  0xca   :  { %v136_v20 = vpop.f32.mrf.mxu0  ;;  %v148_v21 = vpop.f32.mrf.mxu1 }
  0xcb   :  { %v137_v22 = vadd.f32 %v136_v20, %v33_v19  ;;  %v149_v23 = vadd.f32 %v148_v21, %v43_v18 }
  0xcc   :  { %v138_v24 = vpop.f32.mrf.mxu0  ;;  %v150_v25 = vpop.f32.mrf.mxu1 }
  0xcd   :  { %vm159_vm2 = vcmp.ge.f32.partialorder %v137_v22, 0.0  ;;  %v167_v26 = vmul.f32 0.1, %v137_v22  ;;  %vm163_vm3 = vcmp.ge.f32.partialorder %v149_v23, 0.0  ;;  %v171_v27 = vmul.f32 0.1, %v149_v23 }
  0xce   :  { %v139_v30 = vadd.f32 %v138_v24, %v33_v19  ;;  %v151_v31 = vadd.f32 %v150_v25, %v43_v18  ;;  %v142_v32 = vpop.f32.mrf.mxu0  ;;  %v154_v33 = vpop.f32.mrf.mxu1 }
  0xcf   :  { %v175_v34 = vsel %vm159_vm2, %v137_v22, %v167_v26  ;;  %v179_v35 = vsel %vm163_vm3, %v149_v23, %v171_v27  ;;  %v143_v36 = vadd.f32 %v142_v32, %v38_v29  ;;  %v155_v37 = vadd.f32 %v154_v33, %v48_v28 }
  0xd0   :  { %183 = vst [vmem:[%s314_s3] sm:$0xff] %v175_v34  ;;  %187 = vst [vmem:[%s314_s3 + $0x20] sm:$0xff] %v179_v35  ;;  %vm160_vm4 = vcmp.ge.f32.partialorder %v139_v30, 0.0  ;;  %v168_v38 = vmul.f32 0.1, %v139_v30  ;;  %vm164_vm5 = vcmp.ge.f32.partialorder %v151_v31, 0.0  ;;  %v144_v40 = vpop.f32.mrf.mxu0  ;;  %v156_v41 = vpop.f32.mrf.mxu1 }
  0xd1   :  { %v172_v39 = vmul.f32 0.1, %v151_v31  ;;  %vm161_vm6 = vcmp.ge.f32.partialorder %v143_v36, 0.0  ;;  %v169_v42 = vmul.f32 0.1, %v143_v36  ;;  %vm165_vm7 = vcmp.ge.f32.partialorder %v155_v37, 0.0 }
  0xd2   :  { %v173_v43 = vmul.f32 0.1, %v155_v37  ;;  %v176_v44 = vsel %vm160_vm4, %v139_v30, %v168_v38  ;;  %v145_v46 = vadd.f32 %v144_v40, %v38_v29  ;;  %v157_v47 = vadd.f32 %v156_v41, %v48_v28 }
  0xd3   :  { %v180_v45 = vsel %vm164_vm5, %v151_v31, %v172_v39  ;;  %184 = vst [vmem:[%s314_s3 + $0x8] sm:$0xff] %v176_v44  ;;  %v177_v48 = vsel %vm161_vm6, %v143_v36, %v169_v42 }
  0xd4   :  { %188 = vst [vmem:[%s314_s3 + $0x28] sm:$0xff] %v180_v45  ;;  %v181_v49 = vsel %vm165_vm7, %v155_v37, %v173_v43  ;;  %185 = vst [vmem:[%s314_s3 + $0x10] sm:$0xff] %v177_v48  ;;  %vm162_vm8 = vcmp.ge.f32.partialorder %v145_v46, 0.0  ;;  %v170_v50 = vmul.f32 0.1, %v145_v46  ;;  %vm166_vm9 = vcmp.ge.f32.partialorder %v157_v47, 0.0 }
  0xd5   :  { %189 = vst [vmem:[%s314_s3 + $0x30] sm:$0xff] %v181_v49  ;;  %v174_v51 = vmul.f32 0.1, %v157_v47 }
  0xd6   :  { %v178_v52 = vsel %vm162_vm8, %v145_v46, %v170_v50 }
  0xd7   :  { %v182_v53 = vsel %vm166_vm9, %v157_v47, %v174_v51  ;;  %186 = vst [vmem:[%s314_s3 + $0x18] sm:$0xff] %v178_v52 }
  0xd8   :  { %190 = vst [vmem:[%s314_s3 + $0x38] sm:$0xff] %v182_v53 }

</bundles_post_ra>
